<compile_context>
chip_gen: v5e
topology: v5e:2x2
jax: 0.10.0
libtpu: 0.0.40
codegen_flags: <defaults>
</compile_context>

<pallas_src>
import functools

import jax
import jax.numpy as jnp
from jax.experimental import pallas as pl
from jax.experimental.pallas import tpu as pltpu


# ----------------------------------------------------------------------------
# Fused Pallas kernels: patient-encoder stand-in + step-predictor head
# ----------------------------------------------------------------------------
TL_TARGET = 512  # timesteps (rows) per tile; sweep 256-1024 on production shapes


def _round_up(x, m):
    return ((x + m - 1) // m) * m


def _patient_tile(ts_ref, demproj_ref, wts_ref):
    """tanh(ts @ W_ts + (dem @ W_dem + b_pat)) for one (TL, D_ts) tile.

    bf16 MXU operands (in-kernel cast), f32 accumulation, tanh on the EUP slot.
    """
    ts = ts_ref[...].astype(jnp.bfloat16)                       # (TL, D_ts)
    pre = jnp.dot(ts, wts_ref[...], preferred_element_type=jnp.float32)
    pre = pre + demproj_ref[...]                                 # (1, D_pat) broadcast
    return jnp.tanh(pre)                                         # (TL, D_pat) f32


def _patient_only_kernel(ts_ref, demproj_ref, wts_ref, patient_ref):
    patient_ref[...] = _patient_tile(ts_ref, demproj_ref, wts_ref).astype(
        patient_ref.dtype)


def _fused_mlp_kernel(ts_ref, demproj_ref, wts_ref,
                      w1_ref, b1_ref, w2_ref, b2_ref,
                      patient_ref, pred_ref):
    """Patient tile + Linear(2*128) -> ReLU -> Linear head, all in VMEM."""
    patient = _patient_tile(ts_ref, demproj_ref, wts_ref)        # (TL, D_pat) f32
    patient_ref[...] = patient.astype(patient_ref.dtype)
    h = jnp.dot(patient.astype(jnp.bfloat16), w1_ref[...],
                preferred_element_type=jnp.float32) + b1_ref[...]
    h = jnp.maximum(h, 0.0)
    y = jnp.dot(h.astype(jnp.bfloat16), w2_ref[...],
                preferred_element_type=jnp.float32) + b2_ref[...]
    pred_ref[...] = y.astype(pred_ref.dtype)


def _fused_linear_kernel(ts_ref, demproj_ref, wts_ref, w_ref, b_ref,
                         patient_ref, pred_ref):
    """Patient tile + single-Linear head (predictor_mlp=False)."""
    patient = _patient_tile(ts_ref, demproj_ref, wts_ref)
    patient_ref[...] = patient.astype(patient_ref.dtype)
    y = jnp.dot(patient.astype(jnp.bfloat16), w_ref[...],
                preferred_element_type=jnp.float32) + b_ref[...]
    pred_ref[...] = y.astype(pred_ref.dtype)


def _fused_patient_head(ts, dem_proj, w_ts_bf16, head_ws_bf16, head_bs_f32, *,
                        kernel, d_pred, step, with_pred=True,
                        tl_target=TL_TARGET):
    """Tile (N, L) rows of `ts`, compute patient embedding + (optional) head.

    ts:       (N, L, D_ts) f32           -- read as f32, cast in-kernel
    dem_proj: (N, 1, D_pat) f32          -- dem @ W_dem + b_pat (timestep-invariant)
    weights:  full grid-invariant blocks (bf16 matmul operands, f32 biases)
    Returns (patient, pred) or (patient,).
    """
    N, L, d_ts = ts.shape
    d_pat = w_ts_bf16.shape[1]

    tl = min(tl_target, _round_up(L, 8))
    if N == 1 and L > 8:
        # keep >=2 grid steps so v7x megacore has work for both TensorCores
        tl = min(tl, max(8, _round_up(pl.cdiv(L, 2), 8)))
    num_l = pl.cdiv(L, tl)
    grid = (N, num_l)

    arrays = [ts, dem_proj, w_ts_bf16]
    in_specs = [
        pl.BlockSpec((None, tl, d_ts), lambda n, l: (n, l, 0)),
        pl.BlockSpec((None, 1, d_pat), lambda n, l: (n, 0, 0)),
        pl.BlockSpec(w_ts_bf16.shape, lambda n, l: (0, 0)),
    ]
    for w, b in zip(head_ws_bf16, head_bs_f32):
        arrays += [w, b]
        in_specs += [pl.BlockSpec(w.shape, lambda n, l: (0, 0)),
                     pl.BlockSpec(b.shape, lambda n, l: (0, 0))]

    out_shapes = [jax.ShapeDtypeStruct((N, L, d_pat), jnp.float32)]
    out_specs = [pl.BlockSpec((None, tl, d_pat), lambda n, l: (n, l, 0))]

    slice_pred = False
    if with_pred:
        pred_rows = L - step
        # If `step` would make the last L-tile entirely out of bounds for the
        # prediction output, over-allocate it to L rows and slice afterwards
        # (never triggers for step < last-tile size; ragged tails otherwise
        # rely on Pallas's masked partial-block writes).
        tail = L - (num_l - 1) * tl
        slice_pred = step >= tail
        alloc_rows = L if slice_pred else pred_rows
        out_shapes.append(jax.ShapeDtypeStruct((N, alloc_rows, d_pred),
                                               jnp.float32))
        out_specs.append(pl.BlockSpec((None, tl, d_pred), lambda n, l: (n, l, 0)))

    outs = pl.pallas_call(
        kernel,
        out_shape=tuple(out_shapes),
        grid=grid,
        in_specs=in_specs,
        out_specs=tuple(out_specs),
        compiler_params=pltpu.CompilerParams(
            dimension_semantics=("parallel", "parallel"),   # megacore on v7x
            vmem_limit_bytes=32 * 1024 * 1024),              # safe on v5e/v6e/v7x
    )(*arrays)

    if with_pred:
        patient, pred = outs
        if slice_pred:
            pred = pred[:, :L - step]
        return patient, pred
    return outs  # 1-tuple: (patient,)


# ----------------------------------------------------------------------------
# Parameters (deterministic init; independent keys for weight vs bias)
# ----------------------------------------------------------------------------
def init_params(key, n_tables, d_table, d_dem, d_ts_per, d_pat, hidden=256):
    d_ts = n_tables * d_ts_per
    keys = jax.random.split(key, 2 * n_tables + 8)

    def lin(kw, din, dout):
        bound = 1.0 / (din ** 0.5)
        return jax.random.uniform(kw, (din, dout), jnp.float32, -bound, bound)

    def bias(kb, din, dout):
        bound = 1.0 / (din ** 0.5)
        return jax.random.uniform(kb, (1, dout), jnp.float32, -bound, bound)

    params = {
        # stand-in timestep encoders (one per table)
        "ts_enc": [(lin(keys[2 * i], d_table, d_ts_per),
                    bias(keys[2 * i + 1], d_table, d_ts_per))
                   for i in range(n_tables)],
        # stand-in patient encoder
        "w_pat": lin(keys[-8], d_ts + d_dem, d_pat),
        "b_pat": bias(keys[-7], d_ts + d_dem, d_pat),
        # step_predictors[0] (predictor_mlp=True): Linear(d_pat,2*128)->ReLU->Linear(2*128,d_ts)
        "wp1": lin(keys[-6], d_pat, hidden), "bp1": bias(keys[-5], d_pat, hidden),
        "wp2": lin(keys[-4], hidden, d_ts), "bp2": bias(keys[-3], hidden, d_ts),
        # step_predictors[0] (predictor_mlp=False): Linear(d_pat, d_ts)
        "wp_lin": lin(keys[-2], d_pat, d_ts), "bp_lin": bias(keys[-1], d_pat, d_ts),
    }
    return params


# ----------------------------------------------------------------------------
# PredictionModel.forward
# ----------------------------------------------------------------------------
def prediction_model_forward(dem, tables, params, *,
                             prediction_steps=(1,), predictor=True,
                             predictor_mlp=True):
    if len(prediction_steps) == 0:
        raise ValueError
    if len(prediction_steps) > 1:
        raise NotImplementedError
    step = prediction_steps[0]

    N, L, _ = tables[0].shape

    # TODO(synk): TimestepEncoder is an external class; per-table linear+tanh stand-in.
    timesteps = [jnp.tanh(t @ w + b) for t, (w, b) in zip(tables, params["ts_enc"])]
    ts = jnp.concatenate(timesteps, -1)                       # (N, L, D_ts)
    d_ts = ts.shape[-1]

    # TODO(synk): PatientRNNEncoder is an external recurrent encoder; linear+tanh
    # stand-in whose matmul+tanh is fused into the Pallas kernel.  The dem part
    # of concat(ts, dem) @ W is timestep-invariant, so it is folded into a tiny
    # per-patient bias here instead of materializing the concat in HBM.
    w_pat_ts = params["w_pat"][:d_ts].astype(jnp.bfloat16)     # (D_ts, D_pat)
    w_pat_dem = params["w_pat"][d_ts:]                         # (D_dem, D_pat)
    dem_proj = (dem @ w_pat_dem + params["b_pat"])[:, None, :]  # (N, 1, D_pat) f32

    if predictor:
        if predictor_mlp:
            patient_timesteps, predicted_ts = _fused_patient_head(
                ts, dem_proj, w_pat_ts,
                [params["wp1"].astype(jnp.bfloat16),
                 params["wp2"].astype(jnp.bfloat16)],
                [params["bp1"], params["bp2"]],
                kernel=_fused_mlp_kernel, d_pred=params["wp2"].shape[1],
                step=step)
        else:
            patient_timesteps, predicted_ts = _fused_patient_head(
                ts, dem_proj, w_pat_ts,
                [params["wp_lin"].astype(jnp.bfloat16)],
                [params["bp_lin"]],
                kernel=_fused_linear_kernel, d_pred=params["wp_lin"].shape[1],
                step=step)
    else:
        (patient_timesteps,) = _fused_patient_head(
            ts, dem_proj, w_pat_ts, [], [],
            kernel=_patient_only_kernel, d_pred=None, step=step,
            with_pred=False)
        predicted_ts = patient_timesteps[:, :-step]

    true_ts = ts[:, step:]                                     # (N, L-step, D_ts)

    y_pred = {"step": predicted_ts, "step_y": true_ts}
    extra = {"patient": patient_timesteps, "timesteps": timesteps}
    return y_pred, extra


# ----------------------------------------------------------------------------
# Demo
# ----------------------------------------------------------------------------
if __name__ == "__main__":
    N, L = 4, 16                # batch, sequence length
    N_TABLES = 2                # e.g. chartevents + labevents
    D_TABLE, D_DEM = 16, 8      # raw feature dims
    D_TS_PER = 64               # per-table encoder out -> D_TS = 128 (lane-dense)
    D_PAT = 128                 # patient-encoder out (stand-in for pat_hidden_size)
    HIDDEN = 2 * 128            # predictor MLP hidden, as in the reference module

    key = jax.random.PRNGKey(0)
    k_dem, k_t0, k_t1, k_par = jax.random.split(key, 4)

    dem = jax.random.normal(k_dem, (N, D_DEM), jnp.float32)
    tables = (jax.random.normal(k_t0, (N, L, D_TABLE), jnp.float32),
              jax.random.normal(k_t1, (N, L, D_TABLE), jnp.float32))

    params = init_params(k_par, N_TABLES, D_TABLE, D_DEM, D_TS_PER, D_PAT, HIDDEN)

    # --- main path: predictor=True, predictor_mlp=True (fused MLP-head kernel)
    fwd = jax.jit(functools.partial(prediction_model_forward,
                                    prediction_steps=(1,),
                                    predictor=True, predictor_mlp=True))
    y_pred, extra = fwd(dem, tables, params)
    jax.block_until_ready(y_pred["step"])
    jax.block_until_ready(extra["patient"])

    D_TS = N_TABLES * D_TS_PER
    assert y_pred["step"].shape == (N, L - 1, D_TS)
    assert y_pred["step_y"].shape == (N, L - 1, D_TS)
    assert extra["patient"].shape == (N, L, D_PAT)
    assert len(extra["timesteps"]) == N_TABLES

    # pure-JAX f32 reference for the fused patient encoder + predictor head
    ts_ref = jnp.concatenate(
        [jnp.tanh(t @ w + b) for t, (w, b) in zip(tables, params["ts_enc"])], -1)
    dem_b = jnp.broadcast_to(dem[:, None, :], (N, L, D_DEM))
    pat_ref = jnp.tanh(jnp.concatenate([ts_ref, dem_b], -1) @ params["w_pat"]
                       + params["b_pat"])
    h_ref = jnp.maximum(pat_ref[:, :-1] @ params["wp1"] + params["bp1"], 0.0)
    pred_ref = h_ref @ params["wp2"] + params["bp2"]

    err_p = float(jnp.max(jnp.abs(extra["patient"] - pat_ref)))
    err_y = float(jnp.max(jnp.abs(y_pred["step"] - pred_ref)))
    assert err_p < 5e-2, f"patient encoder mismatch: {err_p}"
    assert err_y < 5e-2, f"predictor head mismatch: {err_y}"

    # --- also exercise the predictor_mlp=False (single-Linear head) kernel
    fwd_lin = jax.jit(functools.partial(prediction_model_forward,
                                        prediction_steps=(1,),
                                        predictor=True, predictor_mlp=False))
    y_lin, _ = fwd_lin(dem, tables, params)
    jax.block_until_ready(y_lin["step"])
    pred_lin_ref = pat_ref[:, :-1] @ params["wp_lin"] + params["bp_lin"]
    err_l = float(jnp.max(jnp.abs(y_lin["step"] - pred_lin_ref)))
    assert err_l < 5e-2, f"linear head mismatch: {err_l}"

    # --- and the predictor=False path (patient-only kernel)
    fwd_np = jax.jit(functools.partial(prediction_model_forward,
                                       prediction_steps=(1,),
                                       predictor=False, predictor_mlp=False))
    y_np, extra_np = fwd_np(dem, tables, params)
    jax.block_until_ready(y_np["step"])
    assert y_np["step"].shape == (N, L - 1, D_PAT)
    err_np = float(jnp.max(jnp.abs(extra_np["patient"] - pat_ref)))
    assert err_np < 5e-2, f"patient-only kernel mismatch: {err_np}"

    print("KERNEL_OK")
</pallas_src>

<mosaic_0001>
module attributes {stable_mosaic.version = 11 : i64} {
  func.func @_fused_mlp_kernel(%arg0: i32, %arg1: i32, %arg2: memref<1x16x128xf32, #tpu.memory_space<vmem>>, %arg3: memref<1x1x128xf32, #tpu.memory_space<vmem>>, %arg4: memref<128x128xbf16, #tpu.memory_space<vmem>>, %arg5: memref<128x256xbf16, #tpu.memory_space<vmem>>, %arg6: memref<1x256xf32, #tpu.memory_space<vmem>>, %arg7: memref<256x128xbf16, #tpu.memory_space<vmem>>, %arg8: memref<1x128xf32, #tpu.memory_space<vmem>>, %arg9: memref<1x16x128xf32, #tpu.memory_space<vmem>>, %arg10: memref<1x16x128xf32, #tpu.memory_space<vmem>>) attributes {dimension_semantics = [#tpu.dimension_semantics<parallel>, #tpu.dimension_semantics<parallel>], iteration_bounds = array<i64: 4, 1>, scalar_prefetch = 0 : i64, scratch_operands = 0 : i64, tpu.core_type = #tpu.core_type<tc>, window_params = [{transform_indices = @transform_0, window_bounds = array<i64: 1, 16, 128>}, {transform_indices = @transform_1, window_bounds = array<i64: 1, 1, 128>}, {pipeline_mode = #tpu.pipeline_mode<synchronous>, transform_indices = @transform_2, window_bounds = array<i64: 128, 128>}, {pipeline_mode = #tpu.pipeline_mode<synchronous>, transform_indices = @transform_3, window_bounds = array<i64: 128, 256>}, {pipeline_mode = #tpu.pipeline_mode<synchronous>, transform_indices = @transform_4, window_bounds = array<i64: 1, 256>}, {pipeline_mode = #tpu.pipeline_mode<synchronous>, transform_indices = @transform_5, window_bounds = array<i64: 256, 128>}, {pipeline_mode = #tpu.pipeline_mode<synchronous>, transform_indices = @transform_6, window_bounds = array<i64: 1, 128>}, {transform_indices = @transform_7, window_bounds = array<i64: 1, 16, 128>}, {transform_indices = @transform_8, window_bounds = array<i64: 1, 16, 128>}]} {
    %c0 = arith.constant 0 : index
    %c0_0 = arith.constant 0 : index
    %c0_1 = arith.constant 0 : index
    %0 = vector.load %arg2[%c0, %c0_0, %c0_1] : memref<1x16x128xf32, #tpu.memory_space<vmem>>, vector<1x16x128xf32>
    %1 = vector.shape_cast %0 : vector<1x16x128xf32> to vector<16x128xf32>
    %2 = arith.truncf %1 : vector<16x128xf32> to vector<16x128xbf16>
    %c0_2 = arith.constant 0 : index
    %c0_3 = arith.constant 0 : index
    %3 = vector.load %arg4[%c0_2, %c0_3] : memref<128x128xbf16, #tpu.memory_space<vmem>>, vector<128x128xbf16>
    %cst = arith.constant dense<0.000000e+00> : vector<16x128xf32>
    %4 = tpu.matmul %2, %3, %cst {dimension_numbers = #tpu.dot_dimension_numbers<[1], [0], [0], [1], [0, 0, 1, 1], [], []>} : vector<16x128xbf16>, vector<128x128xbf16>, vector<16x128xf32> -> vector<16x128xf32>
    %c0_4 = arith.constant 0 : index
    %c0_5 = arith.constant 0 : index
    %c0_6 = arith.constant 0 : index
    %5 = vector.load %arg3[%c0_4, %c0_5, %c0_6] : memref<1x1x128xf32, #tpu.memory_space<vmem>>, vector<1x1x128xf32>
    %6 = vector.shape_cast %5 : vector<1x1x128xf32> to vector<1x128xf32>
    %7 = vector.broadcast %6 : vector<1x128xf32> to vector<16x128xf32>
    %8 = arith.addf %4, %7 : vector<16x128xf32>
    %9 = math.tanh %8 : vector<16x128xf32>
    %c0_7 = arith.constant 0 : index
    %c0_8 = arith.constant 0 : index
    %c0_9 = arith.constant 0 : index
    %10 = vector.load %arg9[%c0_7, %c0_8, %c0_9] : memref<1x16x128xf32, #tpu.memory_space<vmem>>, vector<1x16x128xf32>
    %11 = vector.shape_cast %10 : vector<1x16x128xf32> to vector<16x128xf32>
    %12 = vector.shape_cast %9 : vector<16x128xf32> to vector<1x16x128xf32>
    tpu.vector_store %arg9[%c0_7, %c0_8, %c0_9], %12 {strides = array<i32>} : memref<1x16x128xf32, #tpu.memory_space<vmem>>, vector<1x16x128xf32>,
    %13 = arith.truncf %9 : vector<16x128xf32> to vector<16x128xbf16>
    %c0_10 = arith.constant 0 : index
    %c0_11 = arith.constant 0 : index
    %14 = vector.load %arg5[%c0_10, %c0_11] : memref<128x256xbf16, #tpu.memory_space<vmem>>, vector<128x256xbf16>
    %cst_12 = arith.constant dense<0.000000e+00> : vector<16x256xf32>
    %15 = tpu.matmul %13, %14, %cst_12 {dimension_numbers = #tpu.dot_dimension_numbers<[1], [0], [0], [1], [0, 0, 1, 1], [], []>} : vector<16x128xbf16>, vector<128x256xbf16>, vector<16x256xf32> -> vector<16x256xf32>
    %c0_13 = arith.constant 0 : index
    %c0_14 = arith.constant 0 : index
    %16 = vector.load %arg6[%c0_13, %c0_14] : memref<1x256xf32, #tpu.memory_space<vmem>>, vector<1x256xf32>
    %17 = vector.broadcast %16 : vector<1x256xf32> to vector<16x256xf32>
    %18 = arith.addf %15, %17 : vector<16x256xf32>
    %cst_15 = arith.constant 0.000000e+00 : f32
    %19 = vector.broadcast %cst_15 : f32 to vector<16x256xf32>
    %20 = arith.maximumf %18, %19 : vector<16x256xf32>
    %21 = arith.truncf %20 : vector<16x256xf32> to vector<16x256xbf16>
    %c0_16 = arith.constant 0 : index
    %c0_17 = arith.constant 0 : index
    %22 = vector.load %arg7[%c0_16, %c0_17] : memref<256x128xbf16, #tpu.memory_space<vmem>>, vector<256x128xbf16>
    %cst_18 = arith.constant dense<0.000000e+00> : vector<16x128xf32>
    %23 = tpu.matmul %21, %22, %cst_18 {dimension_numbers = #tpu.dot_dimension_numbers<[1], [0], [0], [1], [0, 0, 1, 1], [], []>} : vector<16x256xbf16>, vector<256x128xbf16>, vector<16x128xf32> -> vector<16x128xf32>
    %c0_19 = arith.constant 0 : index
    %c0_20 = arith.constant 0 : index
    %24 = vector.load %arg8[%c0_19, %c0_20] : memref<1x128xf32, #tpu.memory_space<vmem>>, vector<1x128xf32>
    %25 = vector.broadcast %24 : vector<1x128xf32> to vector<16x128xf32>
    %26 = arith.addf %23, %25 : vector<16x128xf32>
    %c0_21 = arith.constant 0 : index
    %c0_22 = arith.constant 0 : index
    %c0_23 = arith.constant 0 : index
    %27 = vector.load %arg10[%c0_21, %c0_22, %c0_23] : memref<1x16x128xf32, #tpu.memory_space<vmem>>, vector<1x16x128xf32>
    %28 = vector.shape_cast %27 : vector<1x16x128xf32> to vector<16x128xf32>
    %29 = vector.shape_cast %26 : vector<16x128xf32> to vector<1x16x128xf32>
    tpu.vector_store %arg10[%c0_21, %c0_22, %c0_23], %29 {strides = array<i32>} : memref<1x16x128xf32, #tpu.memory_space<vmem>>, vector<1x16x128xf32>,
    return
  }
  func.func @transform_0(%arg0: i32, %arg1: i32) -> (i32, i32, i32) {
    %c0_i32 = arith.constant 0 : i32
    %c0_i32_0 = arith.constant 0 : i32
    return %arg0, %arg1, %c0_i32 : i32, i32, i32
  }
  func.func @transform_1(%arg0: i32, %arg1: i32) -> (i32, i32, i32) {
    %c0_i32 = arith.constant 0 : i32
    %c0_i32_0 = arith.constant 0 : i32
    %c0_i32_1 = arith.constant 0 : i32
    return %arg0, %c0_i32, %c0_i32_0 : i32, i32, i32
  }
  func.func @transform_2(%arg0: i32, %arg1: i32) -> (i32, i32) {
    %c0_i32 = arith.constant 0 : i32
    %c0_i32_0 = arith.constant 0 : i32
    %c0_i32_1 = arith.constant 0 : i32
    return %c0_i32, %c0_i32_0 : i32, i32
  }
  func.func @transform_3(%arg0: i32, %arg1: i32) -> (i32, i32) {
    %c0_i32 = arith.constant 0 : i32
    %c0_i32_0 = arith.constant 0 : i32
    %c0_i32_1 = arith.constant 0 : i32
    return %c0_i32, %c0_i32_0 : i32, i32
  }
  func.func @transform_4(%arg0: i32, %arg1: i32) -> (i32, i32) {
    %c0_i32 = arith.constant 0 : i32
    %c0_i32_0 = arith.constant 0 : i32
    %c0_i32_1 = arith.constant 0 : i32
    return %c0_i32, %c0_i32_0 : i32, i32
  }
  func.func @transform_5(%arg0: i32, %arg1: i32) -> (i32, i32) {
    %c0_i32 = arith.constant 0 : i32
    %c0_i32_0 = arith.constant 0 : i32
    %c0_i32_1 = arith.constant 0 : i32
    return %c0_i32, %c0_i32_0 : i32, i32
  }
  func.func @transform_6(%arg0: i32, %arg1: i32) -> (i32, i32) {
    %c0_i32 = arith.constant 0 : i32
    %c0_i32_0 = arith.constant 0 : i32
    %c0_i32_1 = arith.constant 0 : i32
    return %c0_i32, %c0_i32_0 : i32, i32
  }
  func.func @transform_7(%arg0: i32, %arg1: i32) -> (i32, i32, i32) {
    %c0_i32 = arith.constant 0 : i32
    %c0_i32_0 = arith.constant 0 : i32
    return %arg0, %arg1, %c0_i32 : i32, i32, i32
  }
  func.func @transform_8(%arg0: i32, %arg1: i32) -> (i32, i32, i32) {
    %c0_i32 = arith.constant 0 : i32
    %c0_i32_0 = arith.constant 0 : i32
    return %arg0, %arg1, %c0_i32 : i32, i32, i32
  }
}

</mosaic_0001>

<bundles_post_ra>
// kernel: prediction_model_forward.1
= control target key start
LH: loop header
LB: loop body
LE: loop exit
PB: predicated region body
PF: predicated region fallthrough
CT: control target
= control target key end

     0   :  { %s1624_s0 = inlined_call_operand.vmem [shape: f32[4,16,128], index: 0, kind: input, shape index: {}]   ;;  %s1625_s1 = inlined_call_operand.vmem [shape: f32[4,1,128], index: 1, kind: input, shape index: {}]   ;;  %s1626_s2 = inlined_call_operand.vmem [shape: bf16[128,128], index: 2, kind: input, shape index: {}]   ;;  %s1627_s3 = inlined_call_operand.vmem [shape: bf16[128,256], index: 3, kind: input, shape index: {}]   ;;  %s1628_s4 = inlined_call_operand.vmem [shape: f32[1,256], index: 4, kind: input, shape index: {}]   ;;  %s1629_s5 = inlined_call_operand.vmem [shape: bf16[256,128], index: 5, kind: input, shape index: {}]   ;;  %s1630_s6 = inlined_call_operand.vmem [shape: f32[1,128], index: 6, kind: input, shape index: {}]   ;;  %s1631_s7 = inlined_call_operand.hbm [shape: f32[4,16,128], index: 7, kind: output, shape index: {0}]   ;;  %s1632_s8 = inlined_call_operand.vmem [shape: f32[4,15,128], index: 8, kind: output, shape index: {1}]  }
   0x1   :  { %1635 = sst [smem:[#allocation5_spill]] %s1624_s0 }
   0x2   :  { %1636 = sst [smem:[#allocation6_spill]] %s1625_s1 }
   0x3   :  { %1637 = sst [smem:[#allocation7_spill]] %s1626_s2 }
   0x4   :  { %14 = vsyncpa [#allocation3], 0 }
   0x5   :  { %16 = vsyncpa [#allocation3 + $0x1], 0  ;;  %s1325_s27 = smov 0   ;;  %s1327_s28 = smov 0  }
   0x6   :  { %s1329_s29 = smov 0   ;;  %s1331_s30 = smov 0  }
   0x7   :  { %s1333_s9 = smov 0   ;;  %s1335_s10 = smov 0  }
   0x8 LB: > { %s917_s11 = sadd.s32 4294967295, %s1276_s10   ;;  %s918_s12 = sadd.s32 4294967294, %s1276_s10   ;;  %s1276_s10 = sphi %s1335_s10, %s22_s10   ;;  %s1272_s9 = sphi %s1333_s9, %s1649_s9   ;;  %s1268_s30 = sphi %s1331_s30, %s1648_s30   ;;  %s1264_s29 = sphi %s1329_s29, %s1647_s29   ;;  %s1260_s28 = sphi %s1327_s28, %s1646_s28   ;;  %s1256_s27 = sphi %s1325_s27, %s1645_s27  }
   0x9   : > { %s34_s13 = sadd.s32 1, %s1272_s9  ;;  %s202_s14 = sadd.s32 1, %s1264_s29 }
   0xa   : > { %p36_p0 = scmp.ge.s32.totalorder %s34_s13, 4  ;;  %p212_p1 = scmp.ne.s32.totalorder %s1264_s29, %s1260_s28 }
   0xb   : > { %p213_p2 = scmp.eq.s32.totalorder %s917_s11, 3  ;;  %p218_p3 = scmp.ne.s32.totalorder %s1260_s28, %s1256_s27 }
   0xc   : > { %s1651_s13 = smov (%p36_p0, %s34_s13), 0  ;;  %p219_p5 = scmp.eq.s32.totalorder %s918_s12, 3 }
   0xd   : > { %p1365_p4 = por %p213_p2, %p212_p1  ;;  %s197_s16 = ssub.s32 %s1272_s9, %s1651_s13 }
   0xe   : > { %p921_p6 = scmp.ge.s32.totalorder %s1276_s10, 1  ;;  %p200_p7 = scmp.eq.s32.totalorder %s197_s16, 0 }
   0xf   : > { %p1372_p8 = por %p219_p5, %p218_p3  ;;  %p299_p9 = scmp.lt.s32.totalorder %s1276_s10, 5 }
  0x10   : > { %s1378_s18 = scalar_select %p200_p7, %s1264_s29, %s202_s14  }
  0x11   : > { %p300_p10 = pnand %p921_p6, %p299_p9 }
  0x12   : > { %s1640_s2 = sld [smem:[#allocation7_spill]] (!%p300_p10)  ;;  %p350_p11 = scmp.lt.s32.totalorder (!%p300_p10), %s1268_s30, 3 }
  0x13   : > { %303 = sbr.rel (%p300_p10) target bundleno = 486 (0x1e6), region = 48  ;;  %s1641_s1 = sld [smem:[#allocation6_spill]] (!%p300_p10) }
  0x14   : > { %s1642_s0 = sld [smem:[#allocation5_spill]] (!%p300_p10)  ;;  %s1634_s22 = sand.u32 (!%p300_p10), 1, %s1260_s28  }
  0x15   : > { %s922_s23 = sshll.u32 (!%p300_p10), %s1634_s22, 4  ;;  %s1643_s14 = sand.u32 (!%p300_p10), 1, %s1260_s28  }
  0x16   : > { %s762_s16 = scalar_lea.sflag (!%p300_p10), [#allocation3], %s1643_s14 }
  0x18   : > { %v1101_v0 = vld [vmem:[%s1640_s2 + $0x38] sm:$0xff]  ;;  %v1100_v1 = vld [vmem:[%s1640_s2 + $0x30] sm:$0xff]  ;;  %s1400_s19 = scalar_select %p350_p11, %s1268_s30, 3  ;;  %v1009_v8 = vld [vmem:[%s1627_s3 + $0x60] sm:$0xf] }
  0x19   : > { %444 = vmatpush.bf16.msra.mxu0 %v1101_v0  ;;  %v1017_v2 = vld [vmem:[%s1627_s3 + $0x70] sm:$0xf]  ;;  %v1117_v3 = vld [vmem:[%s1627_s3 + $0x74] sm:$0xf0]  ;;  %v1116_v4 = vld [vmem:[%s1627_s3 + $0x74] sm:$0xf] }
  0x1a   : > { %v1019_v5 = vld [vmem:[%s1627_s3 + $0x78] sm:$0xf0]  ;;  %v1018_v6 = vor.u32 %v1117_v3, %v1017_v2  ;;  %v1115_v9 = vld [vmem:[%s1627_s3 + $0x64] sm:$0xf0]  ;;  %v1114_v10 = vld [vmem:[%s1627_s3 + $0x64] sm:$0xf]  ;;  %s361_s21 = scalar_lea.vmem %s1641_s1, %s1400_s19 }
  0x1b   : > { %v1022_v7 = vor.u32 %v1116_v4, %v1019_v5  ;;  %v1011_v11 = vld [vmem:[%s1627_s3 + $0x68] sm:$0xf0]  ;;  %v1010_v13 = vor.u32 %v1115_v9, %v1009_v8  ;;  %v1001_v15 = vld [vmem:[%s1627_s3 + $0x50] sm:$0xf]  ;;  %v1113_v16 = vld [vmem:[%s1627_s3 + $0x54] sm:$0xf0] }
  0x1c   : > { %v1099_v12 = vld [vmem:[%s1640_s2 + $0x28] sm:$0xff]  ;;  %565 = vmatpush.bf16.msra.mxu1 %v1018_v6  ;;  %v1014_v14 = vor.u32 %v1114_v10, %v1011_v11  ;;  %v1112_v17 = vld [vmem:[%s1627_s3 + $0x54] sm:$0xf]  ;;  %v1003_v18 = vld [vmem:[%s1627_s3 + $0x58] sm:$0xf0]  ;;  %v1002_v20 = vor.u32 %v1113_v16, %v1001_v15  ;;  %s1633_s26 = sshll.u32 %s1400_s19, 4 }
  0x1d   : > { %445 = vmatpush.bf16.msra.mxu0 %v1100_v1  ;;  %579 = vmatpush.bf16.msra.mxu2 %v1022_v7  ;;  %v1098_v19 = vld [vmem:[%s1640_s2 + $0x20] sm:$0xff]  ;;  %v1006_v21 = vor.u32 %v1112_v17, %v1003_v18  ;;  %v1097_v22 = vld [vmem:[%s1640_s2 + $0x18] sm:$0xff]  ;;  %v1096_v23 = vld [vmem:[%s1640_s2 + $0x10] sm:$0xff]  ;;  %s357_s20 = scalar_lea.vmem %s1642_s0, %s1633_s26  ;;  %s1543_s26 = scalar_lea.vmem [#allocation2], %s922_s23 }
  0x1e   : > { %v1095_v24 = vld [vmem:[%s1640_s2 + $0x8] sm:$0xff]  ;;  %v1094_v25 = vld [vmem:[%s1640_s2] sm:$0xff]  ;;  %v985_v35 = vld [vmem:[%s1627_s3 + $0x30] sm:$0xf]  ;;  %s785_s11 = sshll.u32 %s1543_s26, 4  ;;  %s786_s11 = int_to_ptr.vmem [resolvable:$true] %s785_s11 }
  0x1f   : > { %v373_v26 = vld [vmem:[%s357_s20] sm:$0xff]  ;;  %v374_v27 = vld [vmem:[%s357_s20 + $0x8] sm:$0xff]  ;;  %v1109_v36 = vld [vmem:[%s1627_s3 + $0x34] sm:$0xf0] }
  0x20   : > { %566 = vmatpush.bf16.msra.mxu1 %v1010_v13  ;;  %v375_v28 = vpack.c.bf16 %v374_v27, %v373_v26  ;;  %v993_v29 = vld [vmem:[%s1627_s3 + $0x40] sm:$0xf]  ;;  %v1111_v30 = vld [vmem:[%s1627_s3 + $0x44] sm:$0xf0]  ;;  %v1110_v31 = vld [vmem:[%s1627_s3 + $0x44] sm:$0xf]  ;;  %v986_v38 = vor.u32 %v1109_v36, %v985_v35 }
  0x21   : > { %446 = vmatpush.bf16.msra.mxu0 %v1099_v12  ;;  %580 = vmatpush.bf16.msra.mxu2 %v1014_v14  ;;  %v994_v32 = vor.u32 %v1111_v30, %v993_v29  ;;  %v995_v33 = vld [vmem:[%s1627_s3 + $0x48] sm:$0xf0]  ;;  %v1108_v37 = vld [vmem:[%s1627_s3 + $0x34] sm:$0xf]  ;;  %v987_v39 = vld [vmem:[%s1627_s3 + $0x38] sm:$0xf0] }
  0x22   : > { %v998_v34 = vor.u32 %v1110_v31, %v995_v33  ;;  %v990_v40 = vor.u32 %v1108_v37, %v987_v39  ;;  %v977_v41 = vld [vmem:[%s1627_s3 + $0x20] sm:$0xf]  ;;  %v1107_v42 = vld [vmem:[%s1627_s3 + $0x24] sm:$0xf0]  ;;  %v1106_v43 = vld [vmem:[%s1627_s3 + $0x24] sm:$0xf] }
  0x23   : > { %v978_v44 = vor.u32 %v1107_v42, %v977_v41  ;;  %v979_v45 = vld [vmem:[%s1627_s3 + $0x28] sm:$0xf0]  ;;  %v969_v47 = vld [vmem:[%s1627_s3 + $0x10] sm:$0xf]  ;;  %v1105_v48 = vld [vmem:[%s1627_s3 + $0x14] sm:$0xf0] }
  0x24   : > { %567 = vmatpush.bf16.msra.mxu1 %v1002_v20  ;;  %v982_v46 = vor.u32 %v1106_v43, %v979_v45  ;;  %v1104_v49 = vld [vmem:[%s1627_s3 + $0x14] sm:$0xf]  ;;  %v970_v50 = vor.u32 %v1105_v48, %v969_v47  ;;  %v971_v51 = vld [vmem:[%s1627_s3 + $0x18] sm:$0xf0]  ;;  %v961_v53 = vld [vmem:[%s1627_s3] sm:$0xf] }
  0x25   : > { %447 = vmatpush.bf16.msra.mxu0 %v1098_v19  ;;  %581 = vmatpush.bf16.msra.mxu2 %v1006_v21  ;;  %v974_v52 = vor.u32 %v1104_v49, %v971_v51  ;;  %v1103_v54 = vld [vmem:[%s1627_s3 + $0x4] sm:$0xf0]  ;;  %v1102_v55 = vld [vmem:[%s1627_s3 + $0x4] sm:$0xf]  ;;  %v963_v57 = vld [vmem:[%s1627_s3 + $0x8] sm:$0xf0] }
  0x26   : > { %v962_v56 = vor.u32 %v1103_v54, %v961_v53  ;;  %v966_v58 = vor.u32 %v1102_v55, %v963_v57  ;;  %v1125_v59 = vld [vmem:[%s1629_s5 + $0x38] sm:$0xff]  ;;  %v1124_v61 = vld [vmem:[%s1629_s5 + $0x30] sm:$0xff]  ;;  %v1123_v63 = vld [vmem:[%s1629_s5 + $0x28] sm:$0xff] }
  0x27   : > { %v1133_v60 = vld [vmem:[%s1629_s5 + $0x78] sm:$0xff]  ;;  %731 = vmatpush.bf16.msra.mxu3 %v1125_v59  ;;  %v1132_v62 = vld [vmem:[%s1629_s5 + $0x70] sm:$0xff]  ;;  %v1131_v0 = vld [vmem:[%s1629_s5 + $0x68] sm:$0xff] }
  0x28   : > { %568 = vmatpush.bf16.msra.mxu1 %v994_v32  ;;  %v1192_v1 = vld [vmem:[%s361_s21] ss:$0 sm:$0xff]  ;;  %v1121_v10 = vld [vmem:[%s1629_s5 + $0x18] sm:$0xff]  ;;  %v1120_v12 = vld [vmem:[%s1629_s5 + $0x10] sm:$0xff]  ;;  %s1134_s21 = sshll.u32 %s1268_s30, 4  ;;  %s1218_s30 = scalar_lea.hbm %s1631_s7, 64 }
  0x29   : > { %448 = vmatpush.bf16.msra.mxu0 %v1097_v22  ;;  %582 = vmatpush.bf16.msra.mxu2 %v998_v34  ;;  %v1122_v2 = vld [vmem:[%s1629_s5 + $0x20] sm:$0xff]  ;;  %v1129_v13 = vld [vmem:[%s1629_s5 + $0x58] sm:$0xff]  ;;  %v1119_v14 = vld [vmem:[%s1629_s5 + $0x8] sm:$0xff]  ;;  %s784_s25 = scalar_lea.hbm %s1631_s7, %s1134_s21 }
  0x2a   : > { %v1130_v11 = vld [vmem:[%s1629_s5 + $0x60] sm:$0xff]  ;;  %v1128_v15 = vld [vmem:[%s1629_s5 + $0x50] sm:$0xff]  ;;  %v1127_v17 = vld [vmem:[%s1629_s5 + $0x48] sm:$0xff]  ;;  %s787_s12 = sshll.u32 %s784_s25, 4  ;;  %s788_s12 = int_to_ptr.hbm [resolvable:$true] %s787_s12 }
  0x2b   : > { %732 = vmatpush.bf16.msra.mxu3 %v1124_v61  ;;  %v1118_v16 = vld [vmem:[%s1629_s5] sm:$0xff]  ;;  %s1212_s22 = sshra.s32 %s788_s12, 4  ;;  %s1213_s22 = int_to_ptr.hbm [resolvable:$true] %s1212_s22 }
  0x2c   : > { %569 = vmatpush.bf16.msra.mxu1 %v986_v38  ;;  %v1126_v18 = vld [vmem:[%s1629_s5 + $0x40] sm:$0xff]  ;;  %s1214_s23 = scalar_lea.hbm %s1213_s22, 16  ;;  %p1219_p1 = scmp.lt.s32.totalorder %s1213_s22, %s1631_s7 }
  0x2d   : > { %449 = vmatpush.bf16.msra.mxu0 %v1096_v23  ;;  %583 = vmatpush.bf16.msra.mxu2 %v990_v40  ;;  %v479_v19 = vld [vmem:[%s1628_s4] sm:$0x3]  ;;  %p1215_p12 = scmp.ne.s32.totalorder %s1213_s22, %s1214_s23  ;;  %p1220_p2 = scmp.lt.s32.totalorder %s1218_s30, %s1214_s23 }
  0x2e   : > { %v481_v21 = vperm.slane %v479_v19, 0 }
  0x2f   : > { %733 = vmatpush.bf16.msra.mxu3 %v1123_v63  ;;  %p1216_p13 = pnand %p1215_p12, %p1365_p4  ;;  %p1221_p3 = por %p1220_p2, %p1219_p1 }
  0x30   : > { %570 = vmatpush.bf16.msra.mxu1 %v978_v44 }
  0x31   : > { %450 = vmatpush.bf16.msra.mxu0 %v1095_v24  ;;  %584 = vmatpush.bf16.msra.mxu2 %v982_v46  ;;  %p1217_p0 = pneg %p1216_p13 }
  0x33   : > { %734 = vmatpush.bf16.msra.mxu3 %v1122_v2  ;;  %p1222_p5 = pnand %p1221_p3, %p1217_p0 }
  0x34   : > { %571 = vmatpush.bf16.msra.mxu1 %v970_v50 }
  0x35   : > { %451 = vmatpush.bf16.msra.mxu0 %v1094_v25  ;;  %585 = vmatpush.bf16.msra.mxu2 %v974_v52  ;;  %v482_v25 = vperm.slane %v479_v19, 1 }
  0x37   : > { %735 = vmatpush.bf16.msra.mxu3 %v1121_v10 }
  0x38   : > { %452 = vmatmul.bf16.vlgmr.msra.gmra.mxu0 %v375_v28  ;;  %572 = vmatpush.bf16.msra.mxu1 %v962_v56 }
  0x39   : > { %586 = vmatpush.bf16.msra.mxu2 %v966_v58  ;;  %745 = vmatpush.bf16.msrb.mxu0 %v1133_v60 }
  0x3b   : > { %736 = vmatpush.bf16.msra.mxu3 %v1120_v12 }
  0x3d   : > { %746 = vmatpush.bf16.msrb.mxu0 %v1132_v62 }
  0x3f   : > { %737 = vmatpush.bf16.msra.mxu3 %v1119_v14 }
  0x41   : > { %747 = vmatpush.bf16.msrb.mxu0 %v1131_v0 }
  0x43   : > { %738 = vmatpush.bf16.msra.mxu3 %v1118_v16 }
  0x45   : > { %748 = vmatpush.bf16.msrb.mxu0 %v1130_v11 }
  0x49   : > { %749 = vmatpush.bf16.msrb.mxu0 %v1129_v13 }
  0x4d   : > { %750 = vmatpush.bf16.msrb.mxu0 %v1128_v15 }
  0x51   : > { %751 = vmatpush.bf16.msrb.mxu0 %v1127_v17 }
  0x55   : > { %752 = vmatpush.bf16.msrb.mxu0 %v1126_v18 }
  0xb5   : > { %v453_v3 = vpop.f32.mrf.mxu0 }
  0xb6   : > { %v454_v4 = vadd.f32 %v1192_v1, %v453_v3 }
  0xb8   : > { %1194 = vtanh.f32 %v454_v4 }
  0xbd   : > { %v455_v5 = vpop.f32.mrf.mxu0 }
  0xbe   : > { %v1195_v6 = vpop.eup %1194  ;;  %v456_v7 = vadd.f32 %v1192_v1, %v455_v5 }
  0xbf   : > { %460 = vst [vmem:[%s1543_s26] sm:$0xff] %v1195_v6 }
  0xc0   : > { %1196 = vtanh.f32 %v456_v7 }
  0xc6   : > { %v1197_v8 = vpop.eup %1196 }
  0xc7   : > { %461 = vst [vmem:[%s1543_s26 + $0x8] sm:$0xff] %v1197_v8  ;;  %v462_v9 = vpack.c.bf16 %v1197_v8, %v1195_v6 }
  0xc9   : > { %573 = vmatmul.bf16.vlgmr.msra.gmra.mxu1 %v462_v9  ;;  %587 = vmatmul.bf16.vlgmr.msra.gmra.mxu2 %v462_v9 }
 0x146   : > { %v574_v20 = vpop.f32.mrf.mxu1 }
 0x147   : > { %v575_v23 = vadd.f32 %v574_v20, %v481_v21 }
 0x149   : > { %v593_v27 = vmax.f32 %v575_v23, 0.0 }
 0x14c   : > { %v588_v22 = vpop.f32.mrf.mxu2 }
 0x14d   : > { %v589_v29 = vadd.f32 %v588_v22, %v482_v25 }
 0x14e   : > { %v576_v24 = vpop.f32.mrf.mxu1 }
 0x14f   : > { %v577_v26 = vadd.f32 %v576_v24, %v481_v21  ;;  %v594_v33 = vmax.f32 %v589_v29, 0.0 }
 0x151   : > { %v595_v28 = vmax.f32 %v577_v26, 0.0 }
 0x153   : > { %v597_v30 = vpack.c.bf16 %v595_v28, %v593_v27 }
 0x154   : > { %v590_v31 = vpop.f32.mrf.mxu2 }
 0x155   : > { %v591_v32 = vadd.f32 %v590_v31, %v482_v25  ;;  %739 = vmatmul.bf16.vlgmr.msra.gmra.mxu3 %v597_v30 }
 0x157   : > { %v596_v34 = vmax.f32 %v591_v32, 0.0 }
 0x159   : > { %v598_v35 = vpack.c.bf16 %v596_v34, %v594_v33 }
 0x15b   : > { %753 = vmatmul.bf16.vlgmr.msrb.gmra.mxu0 %v598_v35 }
 0x15c   : > { %1225 = shalt.err (!%p1222_p5)
}
 0x15d   : > { %s1278_s26 = smov 128   ;;  %s1279_s21 = smov 8   ;;  %v1193_v36 = vld [vmem:[%s1630_s6] ss:$0 sm:$0xff] }
 0x15e   : > { %1135 = dma.vmem_to_hbm [thread:$0]  (%p1365_p4), %s786_s11, 256, %s788_s12, %s762_s16, %s1278_s26, %s1278_s26, %s1279_s21  }
 0x15f   : > { %s1644_s0 = sshll.u32 %s1400_s19, 4 }
 0x160   : > { %s371_s14 = scalar_lea.vmem %s1632_s8, %s1644_s0 }
 0x1d8   : > { %v740_v37 = vpop.f32.mrf.mxu3  ;;  %v754_v38 = vpop.f32.mrf.mxu0 }
 0x1d9   : > { %v741_v39 = vadd.f32 %v1193_v36, %v740_v37 }
 0x1db   : > { %v755_v40 = vadd.f32 %v754_v38, %v741_v39 }
 0x1dd   : > { %759 = vst [vmem:[%s371_s14] sm:$0xff] %v755_v40 }
 0x1e0   : > { %v742_v41 = vpop.f32.mrf.mxu3  ;;  %v756_v43 = vpop.f32.mrf.mxu0 }
 0x1e1   : > { %v743_v42 = vadd.f32 %v1193_v36, %v742_v41 }
 0x1e3   : > { %v757_v44 = vadd.f32 %v756_v43, %v743_v42 }
 0x1e5   : > { %760 = vst [vmem:[%s371_s14 + $0x8] sm:$0xff] %v757_v44 }
 0x1e6 PF: > { %p1141_p4 = scmp.ge.s32.totalorder %s1276_s10, 2  ;;  %s806_s15 = sand.u32 1, %s1256_s27  }
 0x1e7   : > { %s807_s19 = scalar_lea.sflag [#allocation3], %s806_s15 }
 0x1e8   : > { %p1138_p6 = pnand %p1141_p4, %p1372_p8 }
 0x1ea   : > { %p1139_p7 = pneg %p1138_p6 }
 0x1ec   : > { %1251 = dma.done.wait (%p1139_p7), %s807_s19, 256  }
 0x1ed   : > { %1253 = vsyncadd (%p1139_p7), %s807_s19, 4294967040  ;;  %s22_s10 = sadd.s32 1, %s1276_s10   ;;  %s1645_s27 = smov %s1260_s28 }
 0x1ee   : > { %p19_p9 = scmp.ge.s32.totalorder %s22_s10, 6   ;;  %s1646_s28 = smov %s1264_s29 }
 0x1ef   : > { %s1647_s29 = smov %s1378_s18  ;;  %s1648_s30 = smov %s1272_s9 }
 0x1f0   : > { %s1649_s9 = smov %s1651_s13  ;;  %21 = sbr.rel (!%p19_p9) target bundleno = 8 (0x8), region = 98 }
 0x1f5   :  { %825 = vsyncpa [#allocation3], 1 }
 0x1f6   :  { %827 = vsyncpa [#allocation3 + $0x1], 1 }

</bundles_post_ra>
